<compile_context>
chip_gen: v5e
topology: v5e:2x2
jax: 0.10.0
libtpu: 0.0.40
codegen_flags: <defaults>
</compile_context>

<pallas_src>
import functools

import jax
import jax.numpy as jnp
from jax.experimental import pallas as pl
from jax.experimental.pallas import tpu as pltpu


def mlp_kernel(x_ref, wpack_ref, w2_ref, w3_ref, b3_ref, o_ref, *, chunk):
    """One grid step: forward the MLP over a (1, TB) lane block of samples.

    x_ref:     (1, TB)   samples on lanes
    wpack_ref: (H, 3)    columns: [w1, b1, b2]
    w2_ref:    (H, H)    layer-2 weight (PyTorch layout: out x in)
    w3_ref:    (8, H)    layer-3 weight row, zero-padded to 8 sublanes
    b3_ref:    (1, 1)    layer-3 bias (SMEM scalar)
    o_ref:     (1, TB)   outputs on lanes
    """
    # Small operands: loaded once per grid step, hoisted out of the chunk loop.
    w1 = wpack_ref[:, 0:1]          # (H, 1)
    b1 = wpack_ref[:, 1:2]          # (H, 1)
    b2 = wpack_ref[:, 2:3]          # (H, 1)
    w2 = w2_ref[...]                # (H, H)
    w3 = w3_ref[...]                # (8, H)
    b3 = b3_ref[0, 0]               # scalar from SMEM

    n_chunks = x_ref.shape[1] // chunk

    def body(c, carry):
        start = pl.multiple_of(c * chunk, chunk)
        x_c = x_ref[:, pl.ds(start, chunk)]                         # (1, chunk)
        # Layer 1 (in_features == 1): outer product == VPU broadcast mul-add.
        h1 = jnp.maximum(w1 * x_c + b1, 0.0)                        # (H, chunk)
        # Layer 2: the only real matmul -> MXU, f32 accumulation.
        h2 = jnp.dot(w2, h1, preferred_element_type=jnp.float32) + b2
        h2 = jnp.maximum(h2, 0.0)                                   # (H, chunk)
        # Layer 3 (out_features == 1): row-matmul on the otherwise-idle MXU
        # (weight row padded to 8 sublanes; keep row 0).
        y8 = jnp.dot(w3, h2, preferred_element_type=jnp.float32)    # (8, chunk)
        o_ref[:, pl.ds(start, chunk)] = y8[0:1, :] + b3             # (1, chunk)
        return carry

    jax.lax.fori_loop(0, n_chunks, body, 0, unroll=False)


_BATCH_BUCKETS = (256, 512, 1024, 2048, 4096, 8192)


def _bucket_batch(batch):
    """Pad target: small fixed set of sizes -> bounded number of kernel compiles."""
    for b in _BATCH_BUCKETS:
        if batch <= b:
            return b
    return _BATCH_BUCKETS[-1] * pl.cdiv(batch, _BATCH_BUCKETS[-1])


@functools.partial(jax.jit, static_argnames=("chunk",))
def _forward_padded(x_t, params, *, chunk):
    """x_t: (1, B_pad) f32 with B_pad a bucket size.  Returns (1, B_pad) f32."""
    B_pad = x_t.shape[1]
    H1 = params["w1"].shape[0]          # 40
    H2 = params["w2"].shape[0]          # 40
    assert params["w1"].shape[1] == 1 and params["w3"].shape[0] == 1, (
        "kernel specialized for the module's 1->40->40->1 shape")
    assert H1 == H2

    # Lane block per grid step: large enough to amortize the ~600-cycle per-step
    # overhead, capped at 2048 and at B_pad//2 so there are >= 2 grid steps
    # (both v7x TensorCores get work) whenever the batch spans multiple chunks.
    TB = B_pad if B_pad <= 256 else min(2048, B_pad // 2)
    chunk = min(chunk, TB)
    assert TB % chunk == 0 and B_pad % TB == 0

    w1 = params["w1"].astype(jnp.float32).reshape(H1, 1)
    b1 = params["b1"].astype(jnp.float32).reshape(H1, 1)
    b2 = params["b2"].astype(jnp.float32).reshape(H2, 1)
    wpack = jnp.concatenate([w1, b1, b2], axis=1)                       # (H, 3)
    w2 = params["w2"].astype(jnp.float32)                               # (H, H)
    w3 = jnp.pad(params["w3"].astype(jnp.float32), ((0, 7), (0, 0)))    # (8, H)
    b3 = params["b3"].astype(jnp.float32).reshape(1, 1)                 # (1, 1)

    kernel = functools.partial(mlp_kernel, chunk=chunk)

    return pl.pallas_call(
        kernel,
        out_shape=jax.ShapeDtypeStruct((1, B_pad), jnp.float32),
        grid=(B_pad // TB,),
        in_specs=[
            pl.BlockSpec((1, TB), lambda i: (0, i)),              # x (streamed)
            pl.BlockSpec((H1, 3), lambda i: (0, 0)),              # [w1|b1|b2] resident
            pl.BlockSpec((H2, H1), lambda i: (0, 0)),             # w2 resident
            pl.BlockSpec((8, H2), lambda i: (0, 0)),              # w3 (padded) resident
            pl.BlockSpec(memory_space=pltpu.MemorySpace.SMEM),    # b3 scalar
        ],
        out_specs=pl.BlockSpec((1, TB), lambda i: (0, i)),
        compiler_params=pltpu.CompilerParams(
            dimension_semantics=("parallel",),                    # batch tiles across TCs
        ),
    )(x_t, wpack, w2, w3, b3)


def network_forward(x, params, *, chunk=256):
    """Forward pass of `Network`.  x: (B, 1) f32 -> (B, 1) f32."""
    B, in_size = x.shape
    assert in_size == 1, "kernel specialized for input_size == 1"
    B_pad = _bucket_batch(B)
    # Pad/transpose OUTSIDE the jitted kernel so the pallas_call only ever sees
    # bucketed shapes (bounded number of Mosaic compiles).
    x_t = jnp.pad(x.astype(jnp.float32).T, ((0, 0), (0, B_pad - B)))    # (1, B_pad)
    out_t = _forward_padded(x_t, params, chunk=chunk)
    return out_t[:, :B].T                                               # (B, 1)


def init_params(key, input_size=1, output_size=1, hid=(40, 40)):
    """Deterministic init matching nn.Linear's U(-1/sqrt(fan_in), 1/sqrt(fan_in)).

    Weights are stored in PyTorch layout: w (out_features, in_features), b (out_features,).
    """
    ks = jax.random.split(key, 6)

    def lin(kw, kb, fan_in, fan_out):
        bound = 1.0 / jnp.sqrt(jnp.float32(fan_in))
        w = jax.random.uniform(kw, (fan_out, fan_in), jnp.float32, -bound, bound)
        b = jax.random.uniform(kb, (fan_out,), jnp.float32, -bound, bound)
        return w, b

    w1, b1 = lin(ks[0], ks[1], input_size, hid[0])
    w2, b2 = lin(ks[2], ks[3], hid[0], hid[1])
    w3, b3 = lin(ks[4], ks[5], hid[1], output_size)
    return {"w1": w1, "b1": b1, "w2": w2, "b2": b2, "w3": w3, "b3": b3}


def network_forward_ref(x, p):
    h1 = jnp.maximum(x @ p["w1"].T + p["b1"], 0.0)
    h2 = jnp.maximum(h1 @ p["w2"].T + p["b2"], 0.0)
    return h2 @ p["w3"].T + p["b3"]


if __name__ == "__main__":
    key = jax.random.PRNGKey(0)
    k_params, k_x1, k_x2 = jax.random.split(key, 3)

    input_size, output_size = 1, 1
    params = init_params(k_params, input_size, output_size)

    # Small batch (module's typical use): 8 samples -> bucket 256, grid=1, 1 chunk.
    x_small = jax.random.normal(k_x1, (8, input_size), jnp.float32)
    out_small = jax.block_until_ready(network_forward(x_small, params))
    ref_small = network_forward_ref(x_small, params)
    assert out_small.shape == (8, output_size)
    assert jnp.allclose(out_small, ref_small, atol=1e-4, rtol=1e-4)

    # Larger, non-bucket-aligned batch: 1000 -> bucket 1024, grid=2 (both TCs on
    # v7x), 2 inner 256-lane chunks per grid step.
    x_big = jax.random.normal(k_x2, (1000, input_size), jnp.float32)
    out_big = jax.block_until_ready(network_forward(x_big, params))
    ref_big = network_forward_ref(x_big, params)
    assert out_big.shape == (1000, output_size)
    assert jnp.allclose(out_big, ref_big, atol=1e-4, rtol=1e-4)

    print("KERNEL_OK")
</pallas_src>

<mosaic_0001>
module attributes {stable_mosaic.version = 11 : i64} {
  func.func @mlp_kernel(%arg0: i32, %arg1: memref<1x256xf32, #tpu.memory_space<vmem>>, %arg2: memref<40x3xf32, #tpu.memory_space<vmem>>, %arg3: memref<40x40xf32, #tpu.memory_space<vmem>>, %arg4: memref<8x40xf32, #tpu.memory_space<vmem>>, %arg5: memref<1x1xf32, #tpu.memory_space<smem>>, %arg6: memref<1x256xf32, #tpu.memory_space<vmem>>) attributes {dimension_semantics = [#tpu.dimension_semantics<parallel>], iteration_bounds = array<i64: 1>, scalar_prefetch = 0 : i64, scratch_operands = 0 : i64, tpu.core_type = #tpu.core_type<tc>, window_params = [{transform_indices = @transform_0, window_bounds = array<i64: 1, 256>}, {pipeline_mode = #tpu.pipeline_mode<synchronous>, transform_indices = @transform_1, window_bounds = array<i64: 40, 3>}, {pipeline_mode = #tpu.pipeline_mode<synchronous>, transform_indices = @transform_2, window_bounds = array<i64: 40, 40>}, {pipeline_mode = #tpu.pipeline_mode<synchronous>, transform_indices = @transform_3, window_bounds = array<i64: 8, 40>}, {transform_indices = @transform_4, window_bounds = array<i64: 1, 1>}, {transform_indices = @transform_5, window_bounds = array<i64: 1, 256>}]} {
    %c0 = arith.constant 0 : index
    %c0_0 = arith.constant 0 : index
    %0 = vector.load %arg2[%c0, %c0_0] : memref<40x3xf32, #tpu.memory_space<vmem>>, vector<40x1xf32>
    %c0_1 = arith.constant 0 : index
    %c1 = arith.constant 1 : index
    %1 = vector.load %arg2[%c0_1, %c1] : memref<40x3xf32, #tpu.memory_space<vmem>>, vector<40x1xf32>
    %c0_2 = arith.constant 0 : index
    %c2 = arith.constant 2 : index
    %2 = vector.load %arg2[%c0_2, %c2] : memref<40x3xf32, #tpu.memory_space<vmem>>, vector<40x1xf32>
    %c0_3 = arith.constant 0 : index
    %c0_4 = arith.constant 0 : index
    %3 = vector.load %arg3[%c0_3, %c0_4] : memref<40x40xf32, #tpu.memory_space<vmem>>, vector<40x40xf32>
    %c0_5 = arith.constant 0 : index
    %c0_6 = arith.constant 0 : index
    %4 = vector.load %arg4[%c0_5, %c0_6] : memref<8x40xf32, #tpu.memory_space<vmem>>, vector<8x40xf32>
    %c0_7 = arith.constant 0 : index
    %c0_8 = arith.constant 0 : index
    %5 = memref.load %arg5[%c0_7, %c0_8] : memref<1x1xf32, #tpu.memory_space<smem>>
    %c0_i32 = arith.constant 0 : i32
    %c256_i32 = arith.constant 256 : i32
    %6 = arith.muli %c0_i32, %c256_i32 : i32
    %7 = tpu.assume_multiple %6, 256 : i32
    %c0_9 = arith.constant 0 : index
    %8 = arith.index_cast %7 : i32 to index
    %9 = vector.load %arg1[%c0_9, %8] : memref<1x256xf32, #tpu.memory_space<vmem>>, vector<1x256xf32>
    %10 = vector.broadcast %0 : vector<40x1xf32> to vector<40x256xf32>
    %11 = vector.broadcast %9 : vector<1x256xf32> to vector<40x256xf32>
    %12 = arith.mulf %10, %11 : vector<40x256xf32>
    %13 = vector.broadcast %1 : vector<40x1xf32> to vector<40x256xf32>
    %14 = arith.addf %12, %13 : vector<40x256xf32>
    %cst = arith.constant 0.000000e+00 : f32
    %15 = vector.broadcast %cst : f32 to vector<40x256xf32>
    %16 = arith.maximumf %14, %15 : vector<40x256xf32>
    %cst_10 = arith.constant dense<0.000000e+00> : vector<40x256xf32>
    %17 = tpu.matmul %3, %16, %cst_10 {dimension_numbers = #tpu.dot_dimension_numbers<[1], [0], [0], [1], [0, 0, 1, 1], [], []>} : vector<40x40xf32>, vector<40x256xf32>, vector<40x256xf32> -> vector<40x256xf32>
    %18 = vector.broadcast %2 : vector<40x1xf32> to vector<40x256xf32>
    %19 = arith.addf %17, %18 : vector<40x256xf32>
    %cst_11 = arith.constant 0.000000e+00 : f32
    %20 = vector.broadcast %cst_11 : f32 to vector<40x256xf32>
    %21 = arith.maximumf %19, %20 : vector<40x256xf32>
    %cst_12 = arith.constant dense<0.000000e+00> : vector<8x256xf32>
    %22 = tpu.matmul %4, %21, %cst_12 {dimension_numbers = #tpu.dot_dimension_numbers<[1], [0], [0], [1], [0, 0, 1, 1], [], []>} : vector<8x40xf32>, vector<40x256xf32>, vector<8x256xf32> -> vector<8x256xf32>
    %23 = vector.extract_strided_slice %22 {offsets = [0, 0], sizes = [1, 256], strides = [1, 1]} : vector<8x256xf32> to vector<1x256xf32>
    %24 = vector.broadcast %5 : f32 to vector<1x256xf32>
    %25 = arith.addf %23, %24 : vector<1x256xf32>
    %c0_13 = arith.constant 0 : index
    %26 = arith.index_cast %7 : i32 to index
    %27 = vector.load %arg6[%c0_13, %26] : memref<1x256xf32, #tpu.memory_space<vmem>>, vector<1x256xf32>
    tpu.vector_store %arg6[%c0_13, %26], %25 {strides = array<i32>} : memref<1x256xf32, #tpu.memory_space<vmem>>, vector<1x256xf32>,
    %c1_i32 = arith.constant 1 : i32
    return
  }
  func.func @transform_0(%arg0: i32) -> (i32, i32) {
    %c0_i32 = arith.constant 0 : i32
    %c0_i32_0 = arith.constant 0 : i32
    return %c0_i32, %arg0 : i32, i32
  }
  func.func @transform_1(%arg0: i32) -> (i32, i32) {
    %c0_i32 = arith.constant 0 : i32
    %c0_i32_0 = arith.constant 0 : i32
    %c0_i32_1 = arith.constant 0 : i32
    return %c0_i32, %c0_i32_0 : i32, i32
  }
  func.func @transform_2(%arg0: i32) -> (i32, i32) {
    %c0_i32 = arith.constant 0 : i32
    %c0_i32_0 = arith.constant 0 : i32
    %c0_i32_1 = arith.constant 0 : i32
    return %c0_i32, %c0_i32_0 : i32, i32
  }
  func.func @transform_3(%arg0: i32) -> (i32, i32) {
    %c0_i32 = arith.constant 0 : i32
    %c0_i32_0 = arith.constant 0 : i32
    %c0_i32_1 = arith.constant 0 : i32
    return %c0_i32, %c0_i32_0 : i32, i32
  }
  func.func @transform_4(%arg0: i32) -> (i32, i32) {
    %c0_i32 = arith.constant 0 : i32
    %c0_i32_0 = arith.constant 0 : i32
    %c0_i32_1 = arith.constant 0 : i32
    return %c0_i32, %c0_i32_0 : i32, i32
  }
  func.func @transform_5(%arg0: i32) -> (i32, i32) {
    %c0_i32 = arith.constant 0 : i32
    %c0_i32_0 = arith.constant 0 : i32
    return %c0_i32, %arg0 : i32, i32
  }
}

</mosaic_0001>

<bundles_post_ra>
// kernel: _forward_padded.1
= control target key start
LH: loop header
LB: loop body
LE: loop exit
PB: predicated region body
PF: predicated region fallthrough
CT: control target
= control target key end

     0   :  { %v361_v1 = vmov 1   ;;  %v362_v2 = vmov 0   ;;  %s449_s0 = inlined_call_operand.vmem [shape: f32[1,256], index: 0, kind: input, shape index: {}]   ;;  %s450_s1 = inlined_call_operand.vmem [shape: f32[40,3], index: 1, kind: input, shape index: {}]   ;;  %s451_s2 = inlined_call_operand.vmem [shape: f32[40,40], index: 2, kind: input, shape index: {}]   ;;  %s452_s3 = inlined_call_operand.vmem [shape: f32[8,40], index: 3, kind: input, shape index: {}]   ;;  %s453_s4 = inlined_call_operand.<no memory space> [shape: f32[1,1], index: 4, kind: input, shape index: {}]   ;;  %s454_s5 = inlined_call_operand.hbm [shape: f32[1,256], index: 5, kind: output, shape index: {}]  }
   0x1   :  { %v26_v0 = vld [vmem:[%s450_s1 + $0x20] sm:$0xff]  ;;  %325 = vset.pattern.permute.xlu1 %v361_v1  ;;  %324 = vset.pattern.permute.xlu0 %v362_v2 }
   0x2   :  { %11 = vsyncpa [#allocation4], 0  ;;  %92 = vperm.xlu1 %325, %v26_v0   ;;  %57 = vperm.xlu0 %324, %v26_v0   ;;  %v25_v3 = vld [vmem:[%s450_s1 + $0x18] sm:$0xff]  ;;  %v24_v4 = vld [vmem:[%s450_s1 + $0x10] sm:$0xff]  ;;  %v363_v17 = vmov 2   ;;  %vm135_vm0 = vcmask 326656  }
   0x3   :  { %327 = vset.pattern.permute.xlu2 %v361_v1  ;;  %v23_v5 = vld [vmem:[%s450_s1 + $0x8] sm:$0xff]  ;;  %v22_v6 = vld [vmem:[%s450_s1] sm:$0xff]  ;;  %v30_v51 = vld [vmem:[%s451_s2 + $0x18] sm:$0xff]  ;;  %s364_s16 = smov [#allocation3]   ;;  %vm274_vm1 = vcmask 1040384  }
   0x4   :  { %88 = vperm.xlu2 %327, %v25_v3   ;;  %v34_v7 = vld [vmem:[%s449_s0] sm:$0x3]  ;;  %v28_v54 = vld [vmem:[%s451_s2 + $0x8] sm:$0xff]  ;;  %v29_v55 = vld [vmem:[%s451_s2 + $0x10] sm:$0xff]  ;;  %s287_s17 = sshll.u32 %s364_s16, 4  ;;  %s288_s17 = int_to_ptr.vmem [resolvable:$true] %s287_s17 }
   0x5   :  { %v61_v9 = vperm.slane %v34_v7, 0  ;;  %v62_v10 = vperm.slane %v34_v7, 1  ;;  %v27_v52 = vld [vmem:[%s451_s2] sm:$0xff] }
   0x6   :  { %v31_v53 = vld [vmem:[%s451_s2 + $0x20] sm:$0xff] }
   0xa   :  { %326 = vset.pattern.permute.xlu1 %v362_v2  ;;  %52 = vperm.xlu0 %324, %v25_v3  }
   0xb   :  { %47 = vperm.xlu1 %326, %v24_v4  }
   0xc   :  { %328 = vset.pattern.permute.xlu2 %v362_v2 }
   0xd   :  { %42 = vperm.xlu2 %328, %v23_v5  }
  0x12   :  { %329 = vset.pattern.permute.xlu0 %v361_v1 }
  0x13   :  { %84 = vperm.xlu0 %329, %v24_v4   ;;  %37 = vperm.xlu1 %326, %v22_v6  }
  0x15   :  { %330 = vset.pattern.permute.xlu2 %v361_v1 }
  0x16   :  { %80 = vperm.xlu2 %330, %v23_v5  }
  0x1b   :  { %331 = vset.pattern.permute.xlu1 %v361_v1  ;;  %333 = vset.pattern.permute.xlu0 %v363_v17 }
  0x1c   :  { %76 = vperm.xlu1 %331, %v22_v6   ;;  %128 = vperm.xlu0 %333, %v25_v3  }
  0x1e   :  { %332 = vset.pattern.permute.xlu2 %v363_v17 }
  0x1f   :  { %132 = vperm.xlu2 %332, %v26_v0  }
  0x24   :  { %334 = vset.pattern.permute.xlu1 %v363_v17 }
  0x25   :  { %124 = vperm.xlu1 %334, %v24_v4  }
  0x27   :  { %120 = vperm.xlu2 %332, %v23_v5  }
  0x2d   :  { %116 = vperm.xlu1 %334, %v22_v6  }
  0x5e   :  { %v89_v8 = vpop.permute.xlu2 %88 }
  0x67   :  { %v43_v20 = vpop.permute.xlu2 %42 }
  0x68   :  { %v67_v29 = vmul.f32 %v61_v9, %v43_v20  ;;  %v68_v30 = vmul.f32 %v62_v10, %v43_v20 }
  0x70   :  { %v81_v31 = vpop.permute.xlu2 %80 }
  0x71   :  { %v97_v38 = vadd.f32 %v81_v31, %v67_v29  ;;  %v98_v39 = vadd.f32 %v81_v31, %v68_v30  ;;  %v277_v29 = vlaneseq }
  0x73   :  { %v107_v42 = vmax.f32 %v97_v38, 0.0  ;;  %v108_v43 = vmax.f32 %v98_v39, 0.0  ;;  %vm279_vm2 = vcmp.lt.s32.totalorder %v277_v29, 256 }
  0x74   :  { %v93_v11 = vpop.permute.xlu1 %92  ;;  %v58_v12 = vpop.permute.xlu0 %57 }
  0x75   :  { %v73_v13 = vmul.f32 %v61_v9, %v58_v12  ;;  %v74_v14 = vmul.f32 %v62_v10, %v58_v12 }
  0x77   :  { %v103_v15 = vadd.f32 %v93_v11, %v73_v13  ;;  %v104_v16 = vadd.f32 %v93_v11, %v74_v14 }
  0x79   :  { %v113_v18 = vmax.f32 %v103_v15, 0.0  ;;  %v114_v19 = vmax.f32 %v104_v16, 0.0  ;;  %v133_v58 = vpop.permute.xlu2 %132 }
  0x7b   :  { %162 = vmatpush.msra.mxu0 %v113_v18  ;;  %310 = vmatpush.msra.mxu2 %v113_v18 }
  0x7c   :  { %194 = vmatpush.msra.mxu1 %v114_v19  ;;  %315 = vmatpush.msra.mxu3 %v114_v19  ;;  %v53_v21 = vpop.permute.xlu0 %52 }
  0x7d   :  { %v71_v22 = vmul.f32 %v61_v9, %v53_v21  ;;  %v72_v23 = vmul.f32 %v62_v10, %v53_v21  ;;  %v48_v24 = vpop.permute.xlu1 %47 }
  0x7e   :  { %v69_v32 = vmul.f32 %v61_v9, %v48_v24  ;;  %v70_v33 = vmul.f32 %v62_v10, %v48_v24 }
  0x7f   :  { %v101_v25 = vadd.f32 %v89_v8, %v71_v22  ;;  %v102_v26 = vadd.f32 %v89_v8, %v72_v23 }
  0x81   :  { %v111_v27 = vmax.f32 %v101_v25, 0.0  ;;  %v112_v28 = vmax.f32 %v102_v26, 0.0  ;;  %v121_v7 = vpop.permute.xlu2 %120 }
  0x83   :  { %163 = vmatpush.msra.mxu0 %v111_v27  ;;  %311 = vmatpush.msra.mxu2 %v111_v27  ;;  %v32_v27 = vld [vmem:[%s452_s3] sm:$0xff]  ;;  %s289_s3 = sshll.u32 %s454_s5, 4  ;;  %s290_s3 = int_to_ptr.hbm [resolvable:$true] %s289_s3 }
  0x84   :  { %195 = vmatpush.msra.mxu1 %v112_v28  ;;  %316 = vmatpush.msra.mxu3 %v112_v28  ;;  %v268_v28 = vstv %s453_s4 }
  0x85   :  { %v85_v34 = vpop.permute.xlu0 %84  ;;  %v38_v35 = vpop.permute.xlu1 %37 }
  0x86   :  { %v99_v36 = vadd.f32 %v85_v34, %v69_v32  ;;  %v100_v37 = vadd.f32 %v85_v34, %v70_v33  ;;  %v65_v44 = vmul.f32 %v61_v9, %v38_v35  ;;  %v66_v45 = vmul.f32 %v62_v10, %v38_v35 }
  0x88   :  { %v109_v40 = vmax.f32 %v99_v36, 0.0  ;;  %v110_v41 = vmax.f32 %v100_v37, 0.0 }
  0x8a   :  { %164 = vmatpush.msra.mxu0 %v109_v40  ;;  %312 = vmatpush.msra.mxu2 %v109_v40 }
  0x8b   :  { %196 = vmatpush.msra.mxu1 %v110_v41  ;;  %317 = vmatpush.msra.mxu3 %v110_v41 }
  0x8c   :  { %165 = vmatpush.msra.mxu0 %v107_v42  ;;  %313 = vmatpush.msra.mxu2 %v107_v42 }
  0x8d   :  { %197 = vmatpush.msra.mxu1 %v108_v43  ;;  %318 = vmatpush.msra.mxu3 %v108_v43 }
  0x8e   :  { %v77_v46 = vpop.permute.xlu1 %76  ;;  %v129_v0 = vpop.permute.xlu0 %128 }
  0x8f   :  { %v95_v47 = vadd.f32 %v77_v46, %v65_v44  ;;  %v96_v48 = vadd.f32 %v77_v46, %v66_v45 }
  0x91   :  { %v105_v49 = vmax.f32 %v95_v47, 0.0  ;;  %v106_v50 = vmax.f32 %v96_v48, 0.0 }
  0x93   :  { %166 = vmatpush.msra.mxu0 %v105_v49  ;;  %314 = vmatpush.msra.mxu2 %v105_v49 }
  0x94   :  { %198 = vmatpush.msra.mxu1 %v106_v50  ;;  %319 = vmatpush.msra.mxu3 %v106_v50 }
  0x95   :  { %301 = vmatmul.msk.f32.vlgmr.msra.gmra.mxu2 %vm135_vm0, %v30_v51  ;;  %306 = vmatmul.msk.f32.vlgmr.msra.gmra.mxu3 %vm135_vm0, %v30_v51 }
  0x96   :  { %298 = vmatmul.msk.f32.vlgmr.msra.gmra.mxu0 %vm135_vm0, %v27_v52  ;;  %303 = vmatmul.msk.f32.vlgmr.msra.gmra.mxu1 %vm135_vm0, %v27_v52 }
  0x97   :  { %v125_v61 = vpop.permute.xlu1 %124 }
  0x9d   :  { %302 = vmatmul.msk.f32.gmra.mxu2 %vm135_vm0, %v31_v53  ;;  %307 = vmatmul.msk.f32.gmra.mxu3 %vm135_vm0, %v31_v53 }
  0x9e   :  { %299 = vmatmul.msk.f32.gmra.mxu0 %vm135_vm0, %v28_v54  ;;  %304 = vmatmul.msk.f32.gmra.mxu1 %vm135_vm0, %v28_v54 }
  0x9f   :  { %v117_v12 = vpop.permute.xlu1 %116 }
  0xa6   :  { %300 = vmatmul.msk.f32.gmra.mxu0 %vm135_vm0, %v29_v55  ;;  %305 = vmatmul.msk.f32.gmra.mxu1 %vm135_vm0, %v29_v55 }
 0x113   :  { %v168_v56 = vpop.f32.mrf.mxu0  ;;  %v200_v57 = vpop.f32.mrf.mxu1 }
 0x114   :  { %v169_v19 = vadd.f32 %v168_v56, %v117_v12  ;;  %v201_v20 = vadd.f32 %v200_v57, %v117_v12 }
 0x116   :  { %v215_v25 = vmax.f32 %v169_v19, 0.0  ;;  %v216_v26 = vmax.f32 %v201_v20, 0.0 }
 0x118   :  { %v177_v59 = vpop.f32.mrf.mxu2  ;;  %v209_v60 = vpop.f32.mrf.mxu3 }
 0x119   :  { %v178_v3 = vadd.f32 %v177_v59, %v129_v0  ;;  %v210_v4 = vadd.f32 %v209_v60, %v129_v0 }
 0x11b   :  { %v171_v62 = vpop.f32.mrf.mxu0  ;;  %v203_v63 = vpop.f32.mrf.mxu1  ;;  %v221_v15 = vmax.f32 %v178_v3, 0.0  ;;  %v222_v16 = vmax.f32 %v210_v4, 0.0 }
 0x11c   :  { %v172_v17 = vadd.f32 %v171_v62, %v121_v7  ;;  %v204_v18 = vadd.f32 %v203_v63, %v121_v7 }
 0x11e   :  { %v217_v23 = vmax.f32 %v172_v17, 0.0  ;;  %v218_v24 = vmax.f32 %v204_v18, 0.0 }
 0x120   :  { %v180_v1 = vpop.f32.mrf.mxu2  ;;  %v212_v2 = vpop.f32.mrf.mxu3 }
 0x121   :  { %v181_v5 = vadd.f32 %v180_v1, %v133_v58  ;;  %v213_v6 = vadd.f32 %v212_v2, %v133_v58 }
 0x123   :  { %v223_v8 = vmax.f32 %v181_v5, 0.0  ;;  %v224_v9 = vmax.f32 %v213_v6, 0.0  ;;  %v174_v10 = vpop.f32.mrf.mxu0  ;;  %v206_v11 = vpop.f32.mrf.mxu1 }
 0x124   :  { %v175_v13 = vadd.f32 %v174_v10, %v125_v61  ;;  %v207_v14 = vadd.f32 %v206_v11, %v125_v61 }
 0x125   :  { %239 = vmatpush.msrb.mxu2 %v223_v8  ;;  %259 = vmatpush.msrb.mxu3 %v224_v9 }
 0x126   :  { %v219_v21 = vmax.f32 %v175_v13, 0.0  ;;  %v220_v22 = vmax.f32 %v207_v14, 0.0 }
 0x127   :  { %240 = vmatpush.msrb.mxu2 %v221_v15  ;;  %260 = vmatpush.msrb.mxu3 %v222_v16 }
 0x129   :  { %241 = vmatpush.msrb.mxu2 %v219_v21  ;;  %261 = vmatpush.msrb.mxu3 %v220_v22 }
 0x12b   :  { %242 = vmatpush.msrb.mxu2 %v217_v23  ;;  %262 = vmatpush.msrb.mxu3 %v218_v24 }
 0x12d   :  { %243 = vmatpush.msrb.mxu2 %v215_v25  ;;  %263 = vmatpush.msrb.mxu3 %v216_v26 }
 0x12e   :  { %309 = vmatmul.msk.f32.vlgmr.msrb.gmra.mxu3 %vm135_vm0, %v32_v27  ;;  %308 = vmatmul.msk.f32.vlgmr.msrb.gmra.mxu2 %vm135_vm0, %v32_v27 }
 0x1b1   :  { %v265_v30 = vpop.f32.mrf.mxu3  ;;  %v245_v31 = vpop.f32.mrf.mxu2 }
 0x1b2   :  { %v270_v32 = vadd.f32 %v268_v28, %v265_v30  ;;  %v269_v33 = vadd.f32 %v268_v28, %v245_v31 }
 0x1b4   :  { %v273_v34 = vrot.slane %v270_v32, 7 }
 0x1b6   :  { %v275_v35 = vsel %vm274_vm1, %v269_v33, %v273_v34 }
 0x1b7   :  { %281 = vst.msk [vmem:[#allocation3] sm:$0x3] %vm279_vm2, %v275_v35 }
 0x1b8   :  { %292 = dma.vmem_to_hbm [thread:$0]  %s288_s17, 32, %s290_s3, [#allocation4]  }
 0x1b9   :  { %359 = dma.done.wait [#allocation4], 32  }
 0x1ba   :  { %360 = vsyncadd [#allocation4], 4294967264 }
 0x1bb   :  { %297 = vsyncpa [#allocation4], 1 }

</bundles_post_ra>
